<compile_context>
chip_gen: v5e
topology: v5e:2x2
jax: 0.10.0
libtpu: 0.0.40
codegen_flags: <defaults>
</compile_context>

<pallas_src>
import math
import jax
import jax.numpy as jnp
from jax.experimental import pallas as pl
from jax.experimental.pallas import tpu as pltpu

_HIGHEST = jax.lax.Precision.HIGHEST


def _graph_learning_kernel(x_ref, w0_ref, b0_ref, w1_ref, b1_ref,
                           w2_ref, b2_ref, mod_col_ref, mod_row_ref, out_ref):
    C = out_ref.shape[0]
    CC = C * C
    K = x_ref.shape[0]
    BC = x_ref.shape[1]
    B = BC // C
    f32 = jnp.float32

    # ---- conv0: 1x1 conv over the K axis + ReLU. Full (8,128) tiles, pure VPU. ----
    y = x_ref[0] * w0_ref[0]
    for k in range(1, K):
        y = y + x_ref[k] * w0_ref[k]
    y = jnp.maximum(y + b0_ref[0], 0.0)                               # (B*C, W)

    # ---- conv1: contraction over the lane (W) axis + ReLU (VPU/XLU). ----
    z = jnp.sum(y * w1_ref[...], axis=-1, keepdims=True) + b1_ref[0]
    z = jnp.maximum(z, 0.0)                                           # (B*C, 1)

    # ---- conv2 (C -> C*C) for all B samples in ONE MXU pass. ----
    # w2_ref[i, m] = w2[m, i % C] (wrapper-replicated, lane-dense), bsel[b, i] = (i//C == b):
    #   P[b, m] = sum_i bsel[b,i] * z[i] * w2[m, i % C] = sum_c z[b, c] * w2[m, c]
    ii = jax.lax.broadcasted_iota(jnp.int32, (B, BC), 1)
    bb = jax.lax.broadcasted_iota(jnp.int32, (B, BC), 0)
    bsel = jnp.where((ii >= bb * C) & (ii < (bb + 1) * C), 1.0, 0.0)  # (B, B*C) 0/1 gate
    p = jnp.dot(bsel, z * w2_ref[...],
                preferred_element_type=f32, precision=_HIGHEST)       # (B, C*C)
    a = jnp.maximum(p + b2_ref[...], 0.0)                             # + bias row, ReLU
    mrow = jnp.sum(a, axis=0, keepdims=True) * (1.0 / B)              # (1, C*C) batch mean

    # ---- un-flatten mrow -> M (C,C) and exact M.T with two selection matmuls (MXU),
    #      avoiding any sub-tile reshape / transpose. div-masks are integer range
    #      compares (built here); mod-masks are tiny wrapper constants. ----
    mi = jax.lax.broadcasted_iota(jnp.int32, (C, CC), 1)
    oi = jax.lax.broadcasted_iota(jnp.int32, (C, CC), 0)
    sel_div = jnp.where((mi >= oi * C) & (mi < (oi + 1) * C), 1.0, 0.0)   # [i,m] = (m//C == i)
    mm = jax.lax.broadcasted_iota(jnp.int32, (CC, C), 0)
    jj = jax.lax.broadcasted_iota(jnp.int32, (CC, C), 1)
    div_col = jnp.where((mm >= jj * C) & (mm < (jj + 1) * C), 1.0, 0.0)   # [m,j] = (m//C == j)

    m_mat = jnp.dot(sel_div * mrow, mod_col_ref[...],
                    preferred_element_type=f32, precision=_HIGHEST)   # M[i,j]  = mrow[i*C+j]
    m_t = jnp.dot(mod_row_ref[...] * mrow, div_col,
                  preferred_element_type=f32, precision=_HIGHEST)     # M.T (exact selection)

    # ---- adjacency, degree, normalized Laplacian (diagonal matmuls -> broadcast scaling).
    adj0 = jnp.maximum(m_mat, 0.0)
    adj0_t = jnp.maximum(m_t, 0.0)                                    # == adj0.T
    degree = jnp.sum(adj0, axis=1, keepdims=True)                     # (C,1) pre-symmetrization
    adj = 0.5 * (adj0 + adj0_t)

    r = jax.lax.broadcasted_iota(jnp.int32, (C, C), 0)
    c = jax.lax.broadcasted_iota(jnp.int32, (C, C), 1)
    eye = jnp.where(r == c, 1.0, 0.0)

    # EUP reciprocal (approx=True is available if the accuracy budget allows).
    dvec = pl.reciprocal(jnp.sqrt(degree) + 1e-7, approx=False)       # (C, 1)
    dvec_r = jnp.sum(dvec * eye, axis=0, keepdims=True)               # same values, row layout
    lap = dvec * (degree * eye - adj) * dvec_r

    # ---- Chebyshev orders 2 & 3 on the MXU (order 0 = eye is synthesized in the wrapper).
    third = 2.0 * jnp.dot(lap, lap, preferred_element_type=f32, precision=_HIGHEST) - eye
    fourth = 2.0 * jnp.dot(lap, third, preferred_element_type=f32, precision=_HIGHEST) - lap

    # ---- single lane-dense store: [lap | third | fourth] as one (C, 3C) slab. ----
    out_ref[...] = jnp.concatenate([lap, third, fourth], axis=1)


def graph_learning_forward(x, params):
    """x: (B, C, 4, W) float32. Returns the (4, C, C) multi-order Chebyshev Laplacian."""
    w0, b0, w1, b1, w2, b2 = params
    B, C, K, W = x.shape
    CC = C * C

    # Wrapper-side re-layouts (tiny, one-time, lane-dense where it matters).
    x_t = jnp.transpose(x, (2, 0, 1, 3)).reshape(K, B * C, W)   # (K, B*C, W): full (8,128) tiles
    w1_row = w1.reshape(1, W)
    w2_rep = jnp.tile(w2.T, (B, 1))                             # (B*C, C*C), row i = w2[:, i % C]
    b2_row = b2.reshape(1, CC)
    # Constant 0/1 "mod" selection masks for the flat->(C,C) un-flatten matmuls.
    m_idx = jnp.arange(CC)
    mod_col = (m_idx[:, None] % C == jnp.arange(C)[None, :]).astype(jnp.float32)   # (C*C, C)
    mod_row = (jnp.arange(C)[:, None] == m_idx[None, :] % C).astype(jnp.float32)   # (C, C*C)

    vmem = pl.BlockSpec(memory_space=pltpu.MemorySpace.VMEM)
    smem = pl.BlockSpec(memory_space=pltpu.MemorySpace.SMEM)

    flops = (2 * K * B * C * W + 2 * B * C * W + 2 * B * (B * C) * CC
             + 2 * 2 * C * CC * C + 2 * 2 * C ** 3 + 16 * C * C)
    bytes_accessed = 4 * (K * B * C * W + W + B * C * CC + CC + CC * C + C * CC
                          + K + 2 + 3 * C * C)

    packed = pl.pallas_call(
        _graph_learning_kernel,
        out_shape=jax.ShapeDtypeStruct((C, 3 * C), jnp.float32),
        in_specs=[vmem, smem, smem, vmem, smem, vmem, vmem, vmem, vmem],
        out_specs=vmem,
        cost_estimate=pl.CostEstimate(flops=flops, transcendentals=2 * C,
                                      bytes_accessed=bytes_accessed),
    )(x_t, w0, b0, w1_row, b1, w2_rep, b2_row, mod_col, mod_row)

    eye = jnp.eye(C, dtype=jnp.float32)                         # compile-time constant plane
    lap = packed[:, 0:C]
    third = packed[:, C:2 * C]
    fourth = packed[:, 2 * C:3 * C]
    return jnp.stack([eye, lap, third, fourth], axis=0)


def reference(x, params):
    """Pure-JAX mirror of the PyTorch forward, for correctness checking."""
    w0, b0, w1, b1, w2, b2 = params
    B, C, K, W = x.shape
    y = jax.nn.relu(jnp.einsum("bckw,k->bcw", x, w0) + b0[0])
    z = jax.nn.relu(jnp.einsum("bcw,w->bc", y, w1) + b1[0])
    a = jax.nn.relu(z @ w2.T + b2)                              # (B, C*C)
    m = jnp.mean(a.reshape(B, C, C), axis=0)
    adj = jax.nn.relu(m)
    degree = jnp.sum(adj, axis=1)
    adj = 0.5 * (adj + adj.T)
    degree_l = jnp.diag(degree)
    d_hat = jnp.diag(1.0 / (jnp.sqrt(degree) + 1e-7))
    lap = d_hat @ ((degree_l - adj) @ d_hat)
    eye = jnp.eye(C, dtype=jnp.float32)
    third = 2.0 * lap @ lap - eye
    fourth = 2.0 * lap @ third - lap
    return jnp.stack([eye, lap, third, fourth], axis=0)


if __name__ == "__main__":
    # Keep both kernel and reference matmuls at full f32 accuracy so the self-test can be tight.
    jax.config.update("jax_default_matmul_precision", "highest")

    # Small shapes consistent with the module: channel=8, width=128, K=4, batch=4.
    B, C, K, W = 4, 8, 4, 128

    key = jax.random.PRNGKey(0)
    ks = jax.random.split(key, 5)
    x = jax.random.normal(ks[0], (B, C, K, W), dtype=jnp.float32)

    # Deterministic parameter init (shapes from the nn.Conv2d 1x1 convs in __init__).
    w0 = jax.random.normal(ks[1], (K,), dtype=jnp.float32) * 0.5             # conv0.weight (1,4,1,1)
    b0 = jnp.full((1,), 0.1, dtype=jnp.float32)                              # conv0.bias
    w1 = jax.random.normal(ks[2], (W,), dtype=jnp.float32) / math.sqrt(W)    # conv1.weight (1,W,1,1)
    b1 = jnp.full((1,), 0.1, dtype=jnp.float32)                              # conv1.bias
    w2 = jax.random.normal(ks[3], (C * C, C), dtype=jnp.float32) / math.sqrt(C)        # conv2.weight
    b2 = jnp.abs(jax.random.normal(ks[4], (C * C,), dtype=jnp.float32)) * 0.05 + 0.05  # conv2.bias
    params = (w0, b0, w1, b1, w2, b2)

    out = jax.jit(graph_learning_forward)(x, params)
    out = jax.block_until_ready(out)

    assert out.shape == (4, C, C)
    ref = reference(x, params)
    assert bool(jnp.allclose(out, ref, rtol=1e-4, atol=1e-4)), "mismatch vs pure-JAX reference"
    print("KERNEL_OK")
</pallas_src>

<mosaic_0001>
module attributes {stable_mosaic.version = 11 : i64} {
  func.func @_graph_learning_kernel(%arg0: memref<4x32x128xf32, #tpu.memory_space<vmem>>, %arg1: memref<4xf32, #tpu.memory_space<smem>>, %arg2: memref<1xf32, #tpu.memory_space<smem>>, %arg3: memref<1x128xf32, #tpu.memory_space<vmem>>, %arg4: memref<1xf32, #tpu.memory_space<smem>>, %arg5: memref<32x64xf32, #tpu.memory_space<vmem>>, %arg6: memref<1x64xf32, #tpu.memory_space<vmem>>, %arg7: memref<64x8xf32, #tpu.memory_space<vmem>>, %arg8: memref<8x64xf32, #tpu.memory_space<vmem>>, %arg9: memref<8x24xf32, #tpu.memory_space<vmem>>) attributes {dimension_semantics = [], scalar_prefetch = 0 : i64, scratch_operands = 0 : i64, tpu.core_type = #tpu.core_type<tc>} {
    %c0 = arith.constant 0 : index
    %c0_0 = arith.constant 0 : index
    %c0_1 = arith.constant 0 : index
    %0 = vector.load %arg0[%c0, %c0_0, %c0_1] : memref<4x32x128xf32, #tpu.memory_space<vmem>>, vector<1x32x128xf32>
    %1 = vector.shape_cast %0 : vector<1x32x128xf32> to vector<32x128xf32>
    %c0_2 = arith.constant 0 : index
    %2 = memref.load %arg1[%c0_2] : memref<4xf32, #tpu.memory_space<smem>>
    %3 = vector.broadcast %2 : f32 to vector<32x128xf32>
    %4 = arith.mulf %1, %3 : vector<32x128xf32>
    %c1 = arith.constant 1 : index
    %c0_3 = arith.constant 0 : index
    %c0_4 = arith.constant 0 : index
    %5 = vector.load %arg0[%c1, %c0_3, %c0_4] : memref<4x32x128xf32, #tpu.memory_space<vmem>>, vector<1x32x128xf32>
    %6 = vector.shape_cast %5 : vector<1x32x128xf32> to vector<32x128xf32>
    %c1_5 = arith.constant 1 : index
    %7 = memref.load %arg1[%c1_5] : memref<4xf32, #tpu.memory_space<smem>>
    %8 = vector.broadcast %7 : f32 to vector<32x128xf32>
    %9 = arith.mulf %6, %8 : vector<32x128xf32>
    %10 = arith.addf %4, %9 : vector<32x128xf32>
    %c2 = arith.constant 2 : index
    %c0_6 = arith.constant 0 : index
    %c0_7 = arith.constant 0 : index
    %11 = vector.load %arg0[%c2, %c0_6, %c0_7] : memref<4x32x128xf32, #tpu.memory_space<vmem>>, vector<1x32x128xf32>
    %12 = vector.shape_cast %11 : vector<1x32x128xf32> to vector<32x128xf32>
    %c2_8 = arith.constant 2 : index
    %13 = memref.load %arg1[%c2_8] : memref<4xf32, #tpu.memory_space<smem>>
    %14 = vector.broadcast %13 : f32 to vector<32x128xf32>
    %15 = arith.mulf %12, %14 : vector<32x128xf32>
    %16 = arith.addf %10, %15 : vector<32x128xf32>
    %c3 = arith.constant 3 : index
    %c0_9 = arith.constant 0 : index
    %c0_10 = arith.constant 0 : index
    %17 = vector.load %arg0[%c3, %c0_9, %c0_10] : memref<4x32x128xf32, #tpu.memory_space<vmem>>, vector<1x32x128xf32>
    %18 = vector.shape_cast %17 : vector<1x32x128xf32> to vector<32x128xf32>
    %c3_11 = arith.constant 3 : index
    %19 = memref.load %arg1[%c3_11] : memref<4xf32, #tpu.memory_space<smem>>
    %20 = vector.broadcast %19 : f32 to vector<32x128xf32>
    %21 = arith.mulf %18, %20 : vector<32x128xf32>
    %22 = arith.addf %16, %21 : vector<32x128xf32>
    %c0_12 = arith.constant 0 : index
    %23 = memref.load %arg2[%c0_12] : memref<1xf32, #tpu.memory_space<smem>>
    %24 = vector.broadcast %23 : f32 to vector<32x128xf32>
    %25 = arith.addf %22, %24 : vector<32x128xf32>
    %cst = arith.constant 0.000000e+00 : f32
    %26 = vector.broadcast %cst : f32 to vector<32x128xf32>
    %27 = arith.maximumf %25, %26 : vector<32x128xf32>
    %c0_13 = arith.constant 0 : index
    %c0_14 = arith.constant 0 : index
    %28 = vector.load %arg3[%c0_13, %c0_14] : memref<1x128xf32, #tpu.memory_space<vmem>>, vector<1x128xf32>
    %29 = vector.broadcast %28 : vector<1x128xf32> to vector<32x128xf32>
    %30 = arith.mulf %27, %29 : vector<32x128xf32>
    %cst_15 = arith.constant dense<0.000000e+00> : vector<32xf32>
    %31 = vector.multi_reduction <add>, %30, %cst_15 [1] : vector<32x128xf32> to vector<32xf32>
    %32 = vector.shape_cast %31 : vector<32xf32> to vector<32x1xf32>
    %c0_16 = arith.constant 0 : index
    %33 = memref.load %arg4[%c0_16] : memref<1xf32, #tpu.memory_space<smem>>
    %34 = vector.broadcast %33 : f32 to vector<32x1xf32>
    %35 = arith.addf %32, %34 : vector<32x1xf32>
    %cst_17 = arith.constant 0.000000e+00 : f32
    %36 = vector.broadcast %cst_17 : f32 to vector<32x1xf32>
    %37 = arith.maximumf %35, %36 : vector<32x1xf32>
    %38 = tpu.iota {dimensions = array<i32: 1>} : vector<4x32xi32>
    %39 = tpu.iota {dimensions = array<i32: 0>} : vector<4x32xi32>
    %c8_i32 = arith.constant 8 : i32
    %40 = vector.broadcast %c8_i32 : i32 to vector<4x32xi32>
    %41 = arith.muli %39, %40 : vector<4x32xi32>
    %42 = arith.cmpi sge, %38, %41 : vector<4x32xi32>
    %c1_i32 = arith.constant 1 : i32
    %43 = vector.broadcast %c1_i32 : i32 to vector<4x32xi32>
    %44 = arith.addi %39, %43 : vector<4x32xi32>
    %c8_i32_18 = arith.constant 8 : i32
    %45 = vector.broadcast %c8_i32_18 : i32 to vector<4x32xi32>
    %46 = arith.muli %44, %45 : vector<4x32xi32>
    %47 = arith.cmpi slt, %38, %46 : vector<4x32xi32>
    %48 = arith.andi %42, %47 : vector<4x32xi1>
    %cst_19 = arith.constant 1.000000e+00 : f32
    %cst_20 = arith.constant 0.000000e+00 : f32
    %49 = vector.broadcast %cst_19 : f32 to vector<4x32xf32>
    %50 = vector.broadcast %cst_20 : f32 to vector<4x32xf32>
    %51 = arith.select %48, %49, %50 : vector<4x32xi1>, vector<4x32xf32>
    %c0_21 = arith.constant 0 : index
    %c0_22 = arith.constant 0 : index
    %52 = vector.load %arg5[%c0_21, %c0_22] : memref<32x64xf32, #tpu.memory_space<vmem>>, vector<32x64xf32>
    %53 = vector.broadcast %37 : vector<32x1xf32> to vector<32x64xf32>
    %54 = arith.mulf %53, %52 : vector<32x64xf32>
    %cst_23 = arith.constant dense<0.000000e+00> : vector<4x64xf32>
    %55 = tpu.matmul %51, %54, %cst_23 {dimension_numbers = #tpu.dot_dimension_numbers<[1], [0], [0], [1], [0, 0, 1, 1], [], []>, precision = #tpu.contract_precision<fp32>} : vector<4x32xf32>, vector<32x64xf32>, vector<4x64xf32> -> vector<4x64xf32>
    %c0_24 = arith.constant 0 : index
    %c0_25 = arith.constant 0 : index
    %56 = vector.load %arg6[%c0_24, %c0_25] : memref<1x64xf32, #tpu.memory_space<vmem>>, vector<1x64xf32>
    %57 = vector.broadcast %56 : vector<1x64xf32> to vector<4x64xf32>
    %58 = arith.addf %55, %57 : vector<4x64xf32>
    %cst_26 = arith.constant 0.000000e+00 : f32
    %59 = vector.broadcast %cst_26 : f32 to vector<4x64xf32>
    %60 = arith.maximumf %58, %59 : vector<4x64xf32>
    %cst_27 = arith.constant dense<0.000000e+00> : vector<64xf32>
    %61 = vector.multi_reduction <add>, %60, %cst_27 [0] : vector<4x64xf32> to vector<64xf32>
    %62 = vector.shape_cast %61 : vector<64xf32> to vector<1x64xf32>
    %cst_28 = arith.constant 2.500000e-01 : f32
    %63 = vector.broadcast %cst_28 : f32 to vector<1x64xf32>
    %64 = arith.mulf %62, %63 : vector<1x64xf32>
    %65 = tpu.iota {dimensions = array<i32: 1>} : vector<8x64xi32>
    %66 = tpu.iota {dimensions = array<i32: 0>} : vector<8x64xi32>
    %c8_i32_29 = arith.constant 8 : i32
    %67 = vector.broadcast %c8_i32_29 : i32 to vector<8x64xi32>
    %68 = arith.muli %66, %67 : vector<8x64xi32>
    %69 = arith.cmpi sge, %65, %68 : vector<8x64xi32>
    %c1_i32_30 = arith.constant 1 : i32
    %70 = vector.broadcast %c1_i32_30 : i32 to vector<8x64xi32>
    %71 = arith.addi %66, %70 : vector<8x64xi32>
    %c8_i32_31 = arith.constant 8 : i32
    %72 = vector.broadcast %c8_i32_31 : i32 to vector<8x64xi32>
    %73 = arith.muli %71, %72 : vector<8x64xi32>
    %74 = arith.cmpi slt, %65, %73 : vector<8x64xi32>
    %75 = arith.andi %69, %74 : vector<8x64xi1>
    %cst_32 = arith.constant 1.000000e+00 : f32
    %cst_33 = arith.constant 0.000000e+00 : f32
    %76 = vector.broadcast %cst_32 : f32 to vector<8x64xf32>
    %77 = vector.broadcast %cst_33 : f32 to vector<8x64xf32>
    %78 = arith.select %75, %76, %77 : vector<8x64xi1>, vector<8x64xf32>
    %79 = tpu.iota {dimensions = array<i32: 0>} : vector<64x8xi32>
    %80 = tpu.iota {dimensions = array<i32: 1>} : vector<64x8xi32>
    %c8_i32_34 = arith.constant 8 : i32
    %81 = vector.broadcast %c8_i32_34 : i32 to vector<64x8xi32>
    %82 = arith.muli %80, %81 : vector<64x8xi32>
    %83 = arith.cmpi sge, %79, %82 : vector<64x8xi32>
    %c1_i32_35 = arith.constant 1 : i32
    %84 = vector.broadcast %c1_i32_35 : i32 to vector<64x8xi32>
    %85 = arith.addi %80, %84 : vector<64x8xi32>
    %c8_i32_36 = arith.constant 8 : i32
    %86 = vector.broadcast %c8_i32_36 : i32 to vector<64x8xi32>
    %87 = arith.muli %85, %86 : vector<64x8xi32>
    %88 = arith.cmpi slt, %79, %87 : vector<64x8xi32>
    %89 = arith.andi %83, %88 : vector<64x8xi1>
    %cst_37 = arith.constant 1.000000e+00 : f32
    %cst_38 = arith.constant 0.000000e+00 : f32
    %90 = vector.broadcast %cst_37 : f32 to vector<64x8xf32>
    %91 = vector.broadcast %cst_38 : f32 to vector<64x8xf32>
    %92 = arith.select %89, %90, %91 : vector<64x8xi1>, vector<64x8xf32>
    %93 = vector.broadcast %64 : vector<1x64xf32> to vector<8x64xf32>
    %94 = arith.mulf %78, %93 : vector<8x64xf32>
    %c0_39 = arith.constant 0 : index
    %c0_40 = arith.constant 0 : index
    %95 = vector.load %arg7[%c0_39, %c0_40] : memref<64x8xf32, #tpu.memory_space<vmem>>, vector<64x8xf32>
    %cst_41 = arith.constant dense<0.000000e+00> : vector<8x8xf32>
    %96 = tpu.matmul %94, %95, %cst_41 {dimension_numbers = #tpu.dot_dimension_numbers<[1], [0], [0], [1], [0, 0, 1, 1], [], []>, precision = #tpu.contract_precision<fp32>} : vector<8x64xf32>, vector<64x8xf32>, vector<8x8xf32> -> vector<8x8xf32>
    %c0_42 = arith.constant 0 : index
    %c0_43 = arith.constant 0 : index
    %97 = vector.load %arg8[%c0_42, %c0_43] : memref<8x64xf32, #tpu.memory_space<vmem>>, vector<8x64xf32>
    %98 = vector.broadcast %64 : vector<1x64xf32> to vector<8x64xf32>
    %99 = arith.mulf %97, %98 : vector<8x64xf32>
    %cst_44 = arith.constant dense<0.000000e+00> : vector<8x8xf32>
    %100 = tpu.matmul %99, %92, %cst_44 {dimension_numbers = #tpu.dot_dimension_numbers<[1], [0], [0], [1], [0, 0, 1, 1], [], []>, precision = #tpu.contract_precision<fp32>} : vector<8x64xf32>, vector<64x8xf32>, vector<8x8xf32> -> vector<8x8xf32>
    %cst_45 = arith.constant 0.000000e+00 : f32
    %101 = vector.broadcast %cst_45 : f32 to vector<8x8xf32>
    %102 = arith.maximumf %96, %101 : vector<8x8xf32>
    %cst_46 = arith.constant 0.000000e+00 : f32
    %103 = vector.broadcast %cst_46 : f32 to vector<8x8xf32>
    %104 = arith.maximumf %100, %103 : vector<8x8xf32>
    %cst_47 = arith.constant dense<0.000000e+00> : vector<8xf32>
    %105 = vector.multi_reduction <add>, %102, %cst_47 [1] : vector<8x8xf32> to vector<8xf32>
    %106 = vector.shape_cast %105 : vector<8xf32> to vector<8x1xf32>
    %107 = arith.addf %102, %104 : vector<8x8xf32>
    %cst_48 = arith.constant 5.000000e-01 : f32
    %108 = vector.broadcast %cst_48 : f32 to vector<8x8xf32>
    %109 = arith.mulf %108, %107 : vector<8x8xf32>
    %110 = tpu.iota {dimensions = array<i32: 0>} : vector<8x8xi32>
    %111 = tpu.iota {dimensions = array<i32: 1>} : vector<8x8xi32>
    %112 = arith.cmpi eq, %110, %111 : vector<8x8xi32>
    %cst_49 = arith.constant 1.000000e+00 : f32
    %cst_50 = arith.constant 0.000000e+00 : f32
    %113 = vector.broadcast %cst_49 : f32 to vector<8x8xf32>
    %114 = vector.broadcast %cst_50 : f32 to vector<8x8xf32>
    %115 = arith.select %112, %113, %114 : vector<8x8xi1>, vector<8x8xf32>
    %116 = math.sqrt %106 : vector<8x1xf32>
    %cst_51 = arith.constant 1.000000e-07 : f32
    %117 = vector.broadcast %cst_51 : f32 to vector<8x1xf32>
    %118 = arith.addf %116, %117 : vector<8x1xf32>
    %119 = tpu.reciprocal %118 : vector<8x1xf32> -> vector<8x1xf32>
    %120 = vector.broadcast %119 : vector<8x1xf32> to vector<8x8xf32>
    %121 = arith.mulf %120, %115 : vector<8x8xf32>
    %cst_52 = arith.constant dense<0.000000e+00> : vector<8xf32>
    %122 = vector.multi_reduction <add>, %121, %cst_52 [0] : vector<8x8xf32> to vector<8xf32>
    %123 = vector.shape_cast %122 : vector<8xf32> to vector<1x8xf32>
    %124 = vector.broadcast %106 : vector<8x1xf32> to vector<8x8xf32>
    %125 = arith.mulf %124, %115 : vector<8x8xf32>
    %126 = arith.subf %125, %109 : vector<8x8xf32>
    %127 = vector.broadcast %119 : vector<8x1xf32> to vector<8x8xf32>
    %128 = arith.mulf %127, %126 : vector<8x8xf32>
    %129 = vector.broadcast %123 : vector<1x8xf32> to vector<8x8xf32>
    %130 = arith.mulf %128, %129 : vector<8x8xf32>
    %cst_53 = arith.constant dense<0.000000e+00> : vector<8x8xf32>
    %131 = tpu.matmul %130, %130, %cst_53 {dimension_numbers = #tpu.dot_dimension_numbers<[1], [0], [0], [1], [0, 0, 1, 1], [], []>, precision = #tpu.contract_precision<fp32>} : vector<8x8xf32>, vector<8x8xf32>, vector<8x8xf32> -> vector<8x8xf32>
    %cst_54 = arith.constant 2.000000e+00 : f32
    %132 = vector.broadcast %cst_54 : f32 to vector<8x8xf32>
    %133 = arith.mulf %132, %131 : vector<8x8xf32>
    %134 = arith.subf %133, %115 : vector<8x8xf32>
    %cst_55 = arith.constant dense<0.000000e+00> : vector<8x8xf32>
    %135 = tpu.matmul %130, %134, %cst_55 {dimension_numbers = #tpu.dot_dimension_numbers<[1], [0], [0], [1], [0, 0, 1, 1], [], []>, precision = #tpu.contract_precision<fp32>} : vector<8x8xf32>, vector<8x8xf32>, vector<8x8xf32> -> vector<8x8xf32>
    %cst_56 = arith.constant 2.000000e+00 : f32
    %136 = vector.broadcast %cst_56 : f32 to vector<8x8xf32>
    %137 = arith.mulf %136, %135 : vector<8x8xf32>
    %138 = arith.subf %137, %130 : vector<8x8xf32>
    %139 = tpu.concatenate %130, %134, %138 in 1 : vector<8x8xf32>, vector<8x8xf32>, vector<8x8xf32> -> vector<8x24xf32>
    %c0_57 = arith.constant 0 : index
    %c0_58 = arith.constant 0 : index
    %140 = vector.load %arg9[%c0_57, %c0_58] : memref<8x24xf32, #tpu.memory_space<vmem>>, vector<8x24xf32>
    tpu.vector_store %arg9[%c0_57, %c0_58], %139 {strides = array<i32>} : memref<8x24xf32, #tpu.memory_space<vmem>>, vector<8x24xf32>,
    return
  }
}

</mosaic_0001>

<bundles_post_ra>
// kernel: graph_learning_forward.1
= control target key start
LH: loop header
LB: loop body
LE: loop exit
PB: predicated region body
PF: predicated region fallthrough
CT: control target
= control target key end

     0   :  { %16 = vsyncpa [#allocation5], 0  ;;  %s1279_s12 = smov [#allocation4]   ;;  %s1824_s0 = inlined_call_operand.vmem [shape: f32[4,32,128], index: 0, kind: input, shape index: {}]   ;;  %s1825_s1 = inlined_call_operand.vmem [shape: f32[4], index: 1, kind: input, shape index: {}]   ;;  %s1826_s2 = inlined_call_operand.<no memory space> [shape: f32[1], index: 2, kind: input, shape index: {}]   ;;  %s1827_s3 = inlined_call_operand.vmem [shape: f32[1,128], index: 3, kind: input, shape index: {}]   ;;  %s1828_s4 = inlined_call_operand.<no memory space> [shape: f32[1], index: 4, kind: input, shape index: {}]   ;;  %s1829_s5 = inlined_call_operand.vmem [shape: f32[32,64], index: 5, kind: input, shape index: {}]   ;;  %s1830_s6 = inlined_call_operand.vmem [shape: f32[1,64], index: 6, kind: input, shape index: {}]   ;;  %s1831_s7 = inlined_call_operand.vmem [shape: f32[64,8], index: 7, kind: input, shape index: {}]   ;;  %s1832_s8 = inlined_call_operand.vmem [shape: f32[8,64], index: 8, kind: input, shape index: {}]   ;;  %s1833_s9 = inlined_call_operand.vmem [shape: f32[8,24], index: 9, kind: output, shape index: {}]  }
   0x1   :  { %s24_s11 = sshll.u32 %s1825_s1, 4  ;;  %s25_s11 = int_to_ptr.vmem [resolvable:$true] %s24_s11 }
   0x2   :  { %27 = dma.vmem_to_smem %s25_s11, 16, %s1279_s12, [#allocation5]  }
   0x3   :  { %1277 = dma.done.wait [#allocation5], 16  }
   0x4   :  { %1278 = vsyncadd [#allocation5], 4294967280 }
   0x5   :  { %46 = sfence }
   0x6   :  { %s51_s13 = sld [smem:[#allocation4]]  ;;  %v50_v0 = vld [vmem:[%s1824_s0 + $0x18] sm:$0xff]  ;;  %v48_v2 = vld [vmem:[%s1824_s0 + $0x8] sm:$0xff]  ;;  %v49_v3 = vld [vmem:[%s1824_s0 + $0x10] sm:$0xff]  ;;  %v103_v40 = vstv %s1826_s2  ;;  %v138_v62 = vlaneseq  ;;  %vm161_vm3 = vcmask 261120  }
   0x7   :  { %s1216_s14 = sld [smem:[#allocation4 + $0x1]]  ;;  %v1215_v1 = vld [vmem:[%s1824_s0 + $0x38] sm:$0xff]  ;;  %v1213_v5 = vld [vmem:[%s1824_s0 + $0x28] sm:$0xff]  ;;  %v1214_v6 = vld [vmem:[%s1824_s0 + $0x30] sm:$0xff] }
   0x8   :  { %s1221_s15 = sld [smem:[#allocation4 + $0x2]]  ;;  %v1220_v4 = vld [vmem:[%s1824_s0 + $0x58] sm:$0xff]  ;;  %v1218_v8 = vld [vmem:[%s1824_s0 + $0x48] sm:$0xff]  ;;  %v1219_v9 = vld [vmem:[%s1824_s0 + $0x50] sm:$0xff]  ;;  %v1391_v63 = vshrl.u32 %v138_v62, 7 }
   0x9   :  { %s1226_s18 = sld [smem:[#allocation4 + $0x3]]  ;;  %v1225_v12 = vld [vmem:[%s1824_s0 + $0x78] sm:$0xff]  ;;  %v1223_v14 = vld [vmem:[%s1824_s0 + $0x68] sm:$0xff]  ;;  %v1224_v20 = vld [vmem:[%s1824_s0 + $0x70] sm:$0xff] }
   0xa   :  { %v47_v21 = vld [vmem:[%s1824_s0] sm:$0xff] }
   0xb   :  { %v1212_v22 = vld [vmem:[%s1824_s0 + $0x20] sm:$0xff] }
   0xc   :  { %v52_v7 = vstv %s51_s13  ;;  %v1217_v27 = vld [vmem:[%s1824_s0 + $0x40] sm:$0xff] }
   0xd   :  { %v56_v10 = vmul.f32 %v52_v7, %v50_v0  ;;  %v63_v11 = vstv %s1216_s14  ;;  %v54_v13 = vmul.f32 %v52_v7, %v48_v2  ;;  %v55_v15 = vmul.f32 %v52_v7, %v49_v3  ;;  %v1222_v32 = vld [vmem:[%s1824_s0 + $0x60] sm:$0xff] }
   0xe   :  { %v67_v16 = vmul.f32 %v1215_v1, %v63_v11  ;;  %v78_v17 = vstv %s1221_s15  ;;  %v65_v18 = vmul.f32 %v1213_v5, %v63_v11  ;;  %v66_v19 = vmul.f32 %v1214_v6, %v63_v11  ;;  %v1259_v49 = vld [vmem:[%s1827_s3] ss:$0 sm:$0xff]  ;;  %s1283_s3 = smov 16  }
   0xf   :  { %v82_v23 = vmul.f32 %v1220_v4, %v78_v17  ;;  %v93_v24 = vstv %s1226_s18  ;;  %v80_v25 = vmul.f32 %v1218_v8, %v78_v17  ;;  %v81_v26 = vmul.f32 %v1219_v9, %v78_v17 }
  0x10   :  { %v71_v28 = vadd.f32 %v67_v16, %v56_v10  ;;  %v97_v29 = vmul.f32 %v1225_v12, %v93_v24  ;;  %v69_v30 = vadd.f32 %v65_v18, %v54_v13  ;;  %v95_v31 = vmul.f32 %v1223_v14, %v93_v24  ;;  %v150_v12 = vld [vmem:[%s1829_s5 + $0x8] sm:$0xff] }
  0x11   :  { %v70_v33 = vadd.f32 %v66_v19, %v55_v15  ;;  %v96_v34 = vmul.f32 %v1224_v20, %v93_v24  ;;  %v53_v35 = vmul.f32 %v52_v7, %v47_v21  ;;  %v64_v36 = vmul.f32 %v1212_v22, %v63_v11  ;;  %v152_v11 = vld [vmem:[%s1829_s5 + $0x18] sm:$0xff] }
  0x12   :  { %v86_v37 = vadd.f32 %v82_v23, %v71_v28  ;;  %v84_v38 = vadd.f32 %v80_v25, %v69_v30  ;;  %v79_v39 = vmul.f32 %v1217_v27, %v78_v17  ;;  %v94_v43 = vmul.f32 %v1222_v32, %v93_v24  ;;  %v149_v27 = vld [vmem:[%s1829_s5] sm:$0xff] }
  0x13   :  { %v85_v41 = vadd.f32 %v81_v26, %v70_v33  ;;  %v68_v42 = vadd.f32 %v64_v36, %v53_v35  ;;  %v144_v0 = vadd.s32 1, %v1391_v63  ;;  %v1394_v1 = vand.u32 127, %v138_v62  ;;  %v151_v26 = vld [vmem:[%s1829_s5 + $0x10] sm:$0xff] }
  0x14   :  { %v101_v44 = vadd.f32 %v97_v29, %v86_v37  ;;  %v99_v45 = vadd.f32 %v95_v31, %v84_v38  ;;  %v142_v2 = vmul.u32 8, %v1391_v63  ;;  %v129_v4 = vstv %s1828_s4 }
  0x15   :  { %v100_v46 = vadd.f32 %v96_v34, %v85_v41  ;;  %v83_v47 = vadd.f32 %v79_v39, %v68_v42  ;;  %v145_v3 = vmul.u32 8, %v144_v0  ;;  %v1280_v9 = vmov 0.0  }
  0x16   :  { %v107_v48 = vadd.f32 %v103_v40, %v101_v44  ;;  %v105_v50 = vadd.f32 %v103_v40, %v99_v45  ;;  %vm143_vm0 = vcmp.ge.s32.totalorder %v1394_v1, %v142_v2 }
  0x17   :  { %v98_v51 = vadd.f32 %v94_v43, %v83_v47  ;;  %v106_v54 = vadd.f32 %v103_v40, %v100_v46  ;;  %vm146_vm1 = vcmp.lt.s32.totalorder %v1394_v1, %v145_v3 }
  0x18   :  { %v111_v52 = vmax.f32 %v107_v48, 0.0  ;;  %v109_v53 = vmax.f32 %v105_v50, 0.0  ;;  %vm147_vm2 = vmand %vm143_vm0, %vm146_vm1 }
  0x19   :  { %v104_v55 = vadd.f32 %v103_v40, %v98_v51  ;;  %v110_v58 = vmax.f32 %v106_v54, 0.0  ;;  %v1403_v10 = vsel %vm147_vm2, 1.0, %v1280_v9  ;;  %v409_v54 = vld [vmem:[%s1831_s7 + $0x30] sm:$0xff] }
  0x1a   :  { %v119_v56 = vmul.f32 %v1259_v49, %v111_v52  ;;  %v117_v57 = vmul.f32 %v1259_v49, %v109_v53  ;;  %v163_v15 = vsel %vm161_vm3, %v1403_v10, 0  ;;  %v410_v52 = vld [vmem:[%s1831_s7 + $0x38] sm:$0xff] }
  0x1b   :  { %v108_v59 = vmax.f32 %v104_v55, 0.0  ;;  %v118_v60 = vmul.f32 %v1259_v49, %v110_v58  ;;  %v186_v19 = vsub.f32 %v163_v15, %v163_v15  ;;  %v1428_v53 = vand.u32 4294901760, %v410_v52 }
  0x1c   :  { %126 = vadd.xlane.f32.xlu0 %v119_v56  ;;  %122 = vadd.xlane.f32.xlu1 %v117_v57  ;;  %v1436_v56 = vand.u32 4294901760, %v409_v54  ;;  %v408_v57 = vld [vmem:[%s1831_s7 + $0x28] sm:$0xff] }
  0x1d   :  { %v116_v61 = vmul.f32 %v1259_v49, %v108_v59  ;;  %v187_v31 = vand.u32 4294901760, %v186_v19  ;;  %v1434_v55 = vsub.f32 %v410_v52, %v1428_v53 }
  0x1e   :  { %v1445_v59 = vsub.f32 %v409_v54, %v1436_v56 }
  0x1f   :  { %v188_v39 = vsub.f32 %v186_v19, %v187_v31  ;;  %v458_v58 = vand.u32 4294901760, %v1434_v55 }
  0x20   :  { %v464_v0 = vand.u32 4294901760, %v1445_v59 }
  0x21   :  { %v189_v44 = vand.u32 4294901760, %v188_v39  ;;  %v459_v62 = vsub.f32 %v1434_v55, %v458_v58 }
  0x24   :  { %124 = vadd.xlane.f32.xlu0 %v118_v60  ;;  %120 = vadd.xlane.f32.xlu1 %v116_v61  ;;  %v1448_v60 = vand.u32 4294901760, %v408_v57  ;;  %v407_v61 = vld [vmem:[%s1831_s7 + $0x20] sm:$0xff] }
  0x25   :  { %v1463_v3 = vand.u32 4294901760, %v407_v61 }
  0x26   :  { %v1460_v2 = vsub.f32 %v408_v57, %v1448_v60  ;;  %v362_v57 = vadd.s32 24, %v1391_v63 }
  0x8f   :  { %v127_v5 = vpop.xlane.xlu0 %126  ;;  %v123_v6 = vpop.xlane.xlu1 %122 }
  0x90   :  { %v133_v7 = vadd.f32 %v129_v4, %v127_v5  ;;  %v131_v8 = vadd.f32 %v129_v4, %v123_v6  ;;  %v460_v5 = vand.u32 4294901760, %v459_v62  ;;  %v465_v6 = vsub.f32 %v1445_v59, %v464_v0 }
  0x92   :  { %v137_v13 = vmax.f32 %v133_v7, 0.0  ;;  %v135_v14 = vmax.f32 %v131_v8, 0.0  ;;  %v470_v7 = vand.u32 4294901760, %v1460_v2  ;;  %v1475_v8 = vsub.f32 %v407_v61, %v1463_v3 }
  0x94   :  { %v156_v16 = vmul.f32 %v152_v11, %v137_v13  ;;  %v154_v17 = vmul.f32 %v150_v12, %v135_v14  ;;  %v405_v12 = vld [vmem:[%s1831_s7 + $0x10] sm:$0xff]  ;;  %v466_v13 = vand.u32 4294901760, %v465_v6  ;;  %v471_v14 = vsub.f32 %v1460_v2, %v470_v7 }
  0x95   :  { %v476_v15 = vand.u32 4294901760, %v1475_v8 }
  0x96   :  { %v177_v18 = vand.u32 4294901760, %v156_v16  ;;  %v181_v22 = vand.u32 4294901760, %v154_v17 }
  0x97   :  { %v125_v20 = vpop.xlane.xlu0 %124  ;;  %v121_v21 = vpop.xlane.xlu1 %120 }
  0x98   :  { %v132_v23 = vadd.f32 %v129_v4, %v125_v20  ;;  %v130_v24 = vadd.f32 %v129_v4, %v121_v21  ;;  %178 = vmatpush.msra.mxu0 %v177_v18  ;;  %278 = vmatpush.msra.mxu3 %v177_v18  ;;  %v207_v25 = vsub.f32 %v156_v16, %v177_v18  ;;  %v406_v4 = vld [vmem:[%s1831_s7 + $0x18] sm:$0xff]  ;;  %v1490_v16 = vand.u32 4294901760, %v405_v12 }
  0x99   :  { %v219_v35 = vsub.f32 %v154_v17, %v181_v22  ;;  %v1479_v11 = vand.u32 4294901760, %v406_v4  ;;  %v376_v17 = vadd.s32 1, %v1394_v1  ;;  %v472_v20 = vand.u32 4294901760, %v471_v14 }
  0x9a   :  { %v136_v28 = vmax.f32 %v132_v23, 0.0  ;;  %v134_v29 = vmax.f32 %v130_v24, 0.0  ;;  %249 = vmatpush.msra.mxu2 %v207_v25  ;;  %v208_v30 = vand.u32 4294901760, %v207_v25  ;;  %v477_v21 = vsub.f32 %v1475_v8, %v476_v15 }
  0x9b   :  { %v220_v42 = vand.u32 4294901760, %v219_v35 }
  0x9c   :  { %v155_v32 = vmul.f32 %v151_v26, %v136_v28  ;;  %v153_v33 = vmul.f32 %v149_v27, %v134_v29  ;;  %v209_v34 = vsub.f32 %v207_v25, %v208_v30  ;;  %v403_v25 = vld [vmem:[%s1831_s7] sm:$0xff]  ;;  %v478_v26 = vand.u32 4294901760, %v477_v21 }
  0x9d   :  { %v221_v47 = vsub.f32 %v219_v35, %v220_v42  ;;  %v1519_v29 = vand.u32 4294901760, %v403_v25 }
  0x9e   :  { %v179_v36 = vand.u32 4294901760, %v155_v32  ;;  %v183_v37 = vand.u32 4294901760, %v153_v33  ;;  %v210_v38 = vand.u32 4294901760, %v209_v34 }
  0x9f   :  { %v222_v50 = vand.u32 4294901760, %v221_v47  ;;  %v364_v47 = vadd.s32 40, %v1391_v63 }
  0xa0   :  { %180 = vmatpush.msra.mxu0 %v179_v36  ;;  %211 = vmatpush.msra.mxu1 %v210_v38  ;;  %v213_v40 = vsub.f32 %v155_v32, %v179_v36  ;;  %v225_v41 = vsub.f32 %v153_v33, %v183_v37 }
  0xa1   :  { %280 = vmatpush.msra.mxu3 %v179_v36 }
  0xa2   :  { %182 = vmatpush.msra.mxu0 %v181_v22  ;;  %252 = vmatpush.msra.mxu2 %v213_v40  ;;  %v214_v43 = vand.u32 4294901760, %v213_v40  ;;  %v226_v45 = vand.u32 4294901760, %v225_v41 }
  0xa3   :  { %282 = vmatpush.msra.mxu3 %v181_v22 }
  0xa4   :  { %184 = vmatpush.msra.mxu0 %v183_v37  ;;  %255 = vmatpush.msra.mxu2 %v219_v35  ;;  %v215_v46 = vsub.f32 %v213_v40, %v214_v43  ;;  %v227_v49 = vsub.f32 %v225_v41, %v226_v45  ;;  %v1537_v35 = vsub.f32 %v403_v25, %v1519_v29 }
  0xa5   :  { %284 = vmatpush.msra.mxu3 %v183_v37  ;;  %190 = vmatmul.f32.vlgmr.msra.gmra.mxu0 %v189_v44 }
  0xa6   :  { %307 = vmatpush.msrb.mxu0 %v208_v30  ;;  %258 = vmatpush.msra.mxu2 %v225_v41  ;;  %v216_v48 = vand.u32 4294901760, %v215_v46  ;;  %v228_v51 = vand.u32 4294901760, %v227_v49  ;;  %v1523_v30 = vmul.u32 8, %v1394_v1  ;;  %v500_v40 = vand.u32 4294901760, %v1537_v35 }
  0xa7   :  { %261 = vmatmul.f32.vlgmr.msra.gmra.mxu2 %v186_v19  ;;  %288 = vmatmul.f32.vlgmr.msra.gmra.mxu3 %v187_v31  ;;  %v404_v19 = vld [vmem:[%s1831_s7 + $0x8] sm:$0xff]  ;;  %v1525_v31 = vmul.u32 8, %v376_v17  ;;  %v365_v41 = vadd.s32 48, %v1391_v63  ;;  %v1260_v17 = vld [vmem:[%s1830_s6] ss:$0 sm:$0xff] }
  0xa8   :  { %311 = vmatpush.msrb.mxu0 %v214_v43  ;;  %217 = vmatpush.msra.mxu1 %v216_v48  ;;  %v1507_v23 = vand.u32 4294901760, %v404_v19  ;;  %v501_v43 = vsub.f32 %v1537_v35, %v500_v40  ;;  %vm373_vm10 = vcmp.ge.s32.totalorder %v364_v47, %v1523_v30  ;;  %vm371_vm0 = vcmp.ge.s32.totalorder %v362_v57, %v1523_v30 }
  0xa9   :  { %424 = vmatpush.msrb.mxu2 %v1428_v53  ;;  %461 = vmatpush.msrb.mxu3 %v460_v5  ;;  %vm374_vm7 = vcmp.ge.s32.totalorder %v365_v41, %v1523_v30  ;;  %vm384_vm8 = vcmp.lt.s32.totalorder %v365_v41, %v1525_v31  ;;  %vm383_vm11 = vcmp.lt.s32.totalorder %v364_v47, %v1525_v31 }
  0xaa   :  { %315 = vmatpush.msrb.mxu0 %v220_v42  ;;  %223 = vmatpush.msra.mxu1 %v222_v50  ;;  %v1517_v28 = vsub.f32 %v404_v19, %v1507_v23  ;;  %vm1566_vm9 = vmand %vm374_vm7, %vm384_vm8  ;;  %v502_v48 = vand.u32 4294901760, %v501_v43  ;;  %vm381_vm1 = vcmp.lt.s32.totalorder %v362_v57, %v1525_v31 }
  0xab   :  { %426 = vmatpush.msrb.mxu2 %v1436_v56  ;;  %467 = vmatpush.msrb.mxu3 %v466_v13  ;;  %v400_v50 = vsel %vm1566_vm9, 1.0, %v1280_v9  ;;  %vm1584_vm12 = vmand %vm373_vm10, %vm383_vm11  ;;  %v360_v13 = vadd.s32 8, %v1391_v63  ;;  %vm368_vm10 = vcmp.ge.s32.totalorder %v1391_v63, %v1523_v30 }
  0xac   :  { %319 = vmatpush.msrb.mxu0 %v226_v45  ;;  %229 = vmatpush.msra.mxu1 %v228_v51  ;;  %v494_v34 = vand.u32 4294901760, %v1517_v28  ;;  %v363_v51 = vadd.s32 32, %v1391_v63  ;;  %v1579_v52 = vsub.f32 %v400_v50, %v400_v50  ;;  %vm1624_vm2 = vmand %vm371_vm0, %vm381_vm1  ;;  %vm351_vm0 = vcmask 519168  }
  0xad   :  { %1227 = vmatmul.msk.f32.vlgmr.msra.gmra.mxu1 %vm161_vm3, %v1403_v10  ;;  %1228 = vmatmul.msk.f32.vlgmr.msrb.gmra.mxu0 %vm161_vm3, %v1403_v10  ;;  %vm379_vm8 = vcmp.lt.s32.totalorder %v360_v13, %v1525_v31  ;;  %vm411_vm1 = vcmask 523264  }
  0xae   :  { %338 = vmatpush.msrb.mxu1 %v177_v18  ;;  %519 = vmatpush.msra.mxu0 %v1434_v55  ;;  %v1494_v18 = vsub.f32 %v406_v4, %v1479_v11  ;;  %v495_v39 = vsub.f32 %v1517_v28, %v494_v34  ;;  %vm372_vm13 = vcmp.ge.s32.totalorder %v363_v51, %v1523_v30  ;;  %v1281_v4 = vmov 1.0  }
  0xaf   :  { %428 = vmatpush.msrb.mxu2 %v1448_v60  ;;  %473 = vmatpush.msrb.mxu3 %v472_v20  ;;  %vm382_vm14 = vcmp.lt.s32.totalorder %v363_v51, %v1525_v31 }
  0xb0   :  { %340 = vmatpush.msrb.mxu1 %v179_v36  ;;  %522 = vmatpush.msra.mxu0 %v1445_v59  ;;  %v482_v24 = vand.u32 4294901760, %v1494_v18  ;;  %v496_v42 = vand.u32 4294901760, %v495_v39  ;;  %v696_v59 = vand.u32 4294901760, %v1579_v52  ;;  %vm1597_vm15 = vmand %vm372_vm13, %vm382_vm14  ;;  %vm378_vm13 = vcmp.lt.s32.totalorder %v1391_v63, %v1525_v31 }
  0xb1   :  { %430 = vmatpush.msrb.mxu2 %v1463_v3  ;;  %479 = vmatpush.msrb.mxu3 %v478_v26  ;;  %vm1689_vm14 = vmand %vm368_vm10, %vm378_vm13 }
  0xb2   :  { %342 = vmatpush.msrb.mxu1 %v181_v22  ;;  %525 = vmatpush.msra.mxu0 %v1460_v2  ;;  %v1505_v22 = vsub.f32 %v405_v12, %v1490_v16  ;;  %v483_v32 = vsub.f32 %v1494_v18, %v482_v24  ;;  %v398_v2 = vsel %vm1597_vm15, 1.0, %v1280_v9  ;;  %v361_v12 = vadd.s32 16, %v1391_v63 }
  0xb3   :  { %432 = vmatpush.msrb.mxu2 %v1479_v11  ;;  %v1618_v5 = vsub.f32 %v398_v2, %v398_v2 }
  0xb4   :  { %344 = vmatpush.msrb.mxu1 %v183_v37  ;;  %528 = vmatpush.msra.mxu0 %v1475_v8  ;;  %v488_v27 = vand.u32 4294901760, %v1505_v22  ;;  %v484_v36 = vand.u32 4294901760, %v483_v32  ;;  %v366_v37 = vadd.s32 56, %v1391_v63 }
  0xb5   :  { %1229 = vmatmul.msk.f32.vlgmr.msrb.gmra.mxu1 %vm161_vm3, %v1403_v10  ;;  %434 = vmatpush.msrb.mxu2 %v1490_v16  ;;  %vm370_vm3 = vcmp.ge.s32.totalorder %v361_v12, %v1523_v30 }
  0xb6   :  { %556 = vmatpush.msra.mxu1 %v1428_v53  ;;  %531 = vmatpush.msra.mxu0 %v1494_v18  ;;  %v489_v33 = vsub.f32 %v1505_v22, %v488_v27  ;;  %vm375_vm4 = vcmp.ge.s32.totalorder %v366_v37, %v1523_v30  ;;  %vm385_vm5 = vcmp.lt.s32.totalorder %v366_v37, %v1525_v31 }
  0xb7   :  { %436 = vmatpush.msrb.mxu2 %v1507_v23  ;;  %485 = vmatpush.msrb.mxu3 %v484_v36  ;;  %vm1555_vm6 = vmand %vm375_vm4, %vm385_vm5  ;;  %vm380_vm4 = vcmp.lt.s32.totalorder %v361_v12, %v1525_v31  ;;  %vm369_vm5 = vcmp.ge.s32.totalorder %v360_v13, %v1523_v30 }
  0xb8   :  { %558 = vmatpush.msra.mxu1 %v1436_v56  ;;  %534 = vmatpush.msra.mxu0 %v1505_v22  ;;  %v490_v38 = vand.u32 4294901760, %v489_v33  ;;  %v401_v45 = vsel %vm1555_vm6, 1.0, %v1280_v9  ;;  %vm1658_vm7 = vmand %vm370_vm3, %vm380_vm4  ;;  %v394_v22 = vsel %vm1689_vm14, 1.0, %v1280_v9 }
  0xb9   :  { %438 = vmatpush.msrb.mxu2 %v1519_v29  ;;  %v1571_v49 = vsub.f32 %v401_v45, %v401_v45  ;;  %vm1672_vm11 = vmand %vm369_vm5, %vm379_vm8  ;;  %v1705_v39 = vsub.f32 %v394_v22, %v394_v22  ;;  %vm1205_vm8 = vcmask 195584  }
  0xba   :  { %560 = vmatpush.msra.mxu1 %v1448_v60  ;;  %537 = vmatpush.msra.mxu0 %v1517_v28  ;;  %v395_v37 = vsel %vm1672_vm11, 1.0, %v1280_v9 }
  0xbb   :  { %589 = vmatpush.msra.mxu2 %v458_v58  ;;  %491 = vmatpush.msrb.mxu3 %v490_v38  ;;  %v691_v54 = vand.u32 4294901760, %v1571_v49  ;;  %v399_v58 = vsel %vm1584_vm12, 1.0, %v1280_v9 }
  0xbc   :  { %562 = vmatpush.msra.mxu1 %v1463_v3  ;;  %540 = vmatpush.msra.mxu0 %v1537_v35 }
  0xbd   :  { %593 = vmatpush.msra.mxu2 %v464_v0  ;;  %497 = vmatpush.msrb.mxu3 %v496_v42  ;;  %v692_v62 = vsub.f32 %v1571_v49, %v691_v54  ;;  %v1605_v0 = vsub.f32 %v399_v58, %v399_v58 }
  0xbe   :  { %564 = vmatpush.msra.mxu1 %v1479_v11  ;;  %1230 = vmatpush.msk.msrb.mxu0 %vm1555_vm6, %v1281_v4 }
  0xbf   :  { %597 = vmatpush.msra.mxu2 %v470_v7  ;;  %503 = vmatpush.msrb.mxu3 %v502_v48  ;;  %v693_v6 = vand.u32 4294901760, %v692_v62  ;;  %v701_v7 = vand.u32 4294901760, %v1605_v0 }
  0xc0   :  { %566 = vmatpush.msra.mxu1 %v1490_v16  ;;  %1231 = vmatpush.msk.msrb.mxu0 %vm1566_vm9, %v1281_v4 }
  0xc1   :  { %632 = vmatpush.msra.mxu3 %v1428_v53  ;;  %601 = vmatpush.msra.mxu2 %v476_v15  ;;  %v697_v53 = vsub.f32 %v1579_v52, %v696_v59  ;;  %v706_v15 = vand.u32 4294901760, %v1618_v5  ;;  %v702_v18 = vsub.f32 %v1605_v0, %v701_v7 }
  0xc2   :  { %568 = vmatpush.msra.mxu1 %v1507_v23  ;;  %1232 = vmatpush.msk.msrb.mxu0 %vm1584_vm12, %v1281_v4 }
  0xc3   :  { %634 = vmatpush.msra.mxu3 %v1436_v56  ;;  %605 = vmatpush.msra.mxu2 %v482_v24  ;;  %v698_v14 = vand.u32 4294901760, %v697_v53  ;;  %v397_v56 = vsel %vm1624_vm2, 1.0, %v1280_v9  ;;  %v707_v21 = vsub.f32 %v1618_v5, %v706_v15 }
  0xc4   :  { %570 = vmatpush.msra.mxu1 %v1519_v29  ;;  %v1646_v19 = vsub.f32 %v397_v56, %v397_v56  ;;  %1233 = vmatpush.msk.msrb.mxu0 %vm1597_vm15, %v1281_v4 }
  0xc5   :  { %636 = vmatpush.msra.mxu3 %v1448_v60  ;;  %v703_v60 = vand.u32 4294901760, %v702_v18  ;;  %v708_v26 = vand.u32 4294901760, %v707_v21  ;;  %609 = vmatpush.msra.mxu2 %v488_v27  ;;  %v652_v18 = vld [vmem:[%s1832_s8] sm:$0xff]  ;;  %s1282_s8 = smov 8  }
  0xc6   :  { %694 = vmatpush.msrb.mxu1 %v693_v6  ;;  %v711_v25 = vand.u32 4294901760, %v1646_v19  ;;  %1234 = vmatpush.msk.msrb.mxu0 %vm1624_vm2, %v1281_v4 }
  0xc7   :  { %638 = vmatpush.msra.mxu3 %v1463_v3  ;;  %v396_v3 = vsel %vm1658_vm7, 1.0, %v1280_v9  ;;  %613 = vmatpush.msra.mxu2 %v494_v34  ;;  %v726_v34 = vand.u32 4294901760, %v1705_v39 }
  0xc8   :  { %699 = vmatpush.msrb.mxu1 %v698_v14  ;;  %v1681_v33 = vsub.f32 %v396_v3, %v396_v3  ;;  %v712_v36 = vsub.f32 %v1646_v19, %v711_v25  ;;  %1235 = vmatpush.msk.msrb.mxu0 %vm1658_vm7, %v1281_v4 }
  0xc9   :  { %640 = vmatpush.msra.mxu3 %v1479_v11  ;;  %v1696_v11 = vsub.f32 %v395_v37, %v395_v37  ;;  %617 = vmatpush.msra.mxu2 %v500_v40  ;;  %v727_v47 = vsub.f32 %v1705_v39, %v726_v34 }
  0xca   :  { %704 = vmatpush.msrb.mxu1 %v703_v60  ;;  %v713_v27 = vand.u32 4294901760, %v712_v36  ;;  %v716_v31 = vand.u32 4294901760, %v1681_v33  ;;  %1236 = vmatpush.msk.msrb.mxu0 %vm1672_vm11, %v1281_v4 }
  0xcb   :  { %642 = vmatpush.msra.mxu3 %v1490_v16  ;;  %v721_v43 = vand.u32 4294901760, %v1696_v11  ;;  %v728_v57 = vand.u32 4294901760, %v727_v47 }
  0xcc   :  { %709 = vmatpush.msrb.mxu1 %v708_v26  ;;  %v717_v16 = vsub.f32 %v1681_v33, %v716_v31  ;;  %1237 = vmatpush.msk.msrb.mxu0 %vm1689_vm14, %v1281_v4 }
  0xcd   :  { %644 = vmatpush.msra.mxu3 %v1507_v23  ;;  %v722_v35 = vsub.f32 %v1696_v11, %v721_v43 }
  0xce   :  { %714 = vmatpush.msrb.mxu1 %v713_v27  ;;  %v718_v23 = vand.u32 4294901760, %v717_v16 }
  0xcf   :  { %646 = vmatpush.msra.mxu3 %v1519_v29  ;;  %v723_v50 = vand.u32 4294901760, %v722_v35 }
  0xd0   :  { %719 = vmatpush.msrb.mxu1 %v718_v23 }
  0xd2   :  { %724 = vmatpush.msrb.mxu1 %v723_v50 }
  0xd4   :  { %729 = vmatpush.msrb.mxu1 %v728_v57 }
 0x122   :  { %v191_v20 = vpop.f32.mrf.mxu0 }
 0x123   :  { %v192_v30 = vadd.f32 %v1260_v17, %v191_v20 }
 0x12a   :  { %v232_v41 = vpop.f32.mrf.mxu1  ;;  %v262_v42 = vpop.f32.mrf.mxu2 }
 0x12b   :  { %v233_v28 = vadd.f32 %v232_v41, %v192_v30  ;;  %v289_v45 = vpop.f32.mrf.mxu3  ;;  %v322_v48 = vpop.f32.mrf.mxu0 }
 0x12d   :  { %v263_v40 = vadd.f32 %v262_v42, %v233_v28 }
 0x12f   :  { %v290_v51 = vadd.f32 %v289_v45, %v263_v40 }
 0x131   :  { %v323_v58 = vadd.f32 %v322_v48, %v290_v51 }
 0x132   :  { %v347_v62 = vpop.f32.mrf.mxu1 }
 0x133   :  { %v348_v2 = vadd.f32 %v347_v62, %v323_v58 }
 0x135   :  { %v350_v29 = vmax.f32 %v348_v2, 0.0 }
 0x137   :  { %v352_v53 = vsel %vm351_vm0, %v350_v29, 0.0 }
 0x138   :  { %v353_v6 = vrot.slane %v352_v53, 4 }
 0x13a   :  { %v354_v12 = vadd.f32 %v353_v6, %v352_v53 }
 0x13c   :  { %v355_v13 = vrot.slane %v354_v12, 2 }
 0x13e   :  { %v356_v14 = vadd.f32 %v355_v13, %v354_v12 }
 0x140   :  { %v357_v56 = vrot.slane %v356_v14, 1 }
 0x142   :  { %v358_v17 = vadd.f32 %v357_v56, %v356_v14 }
 0x144   :  { %v359_v20 = vmul.f32 0.25, %v358_v17 }
 0x146   :  { %v653_v21 = vmul.f32 %v652_v18, %v359_v20  ;;  %v402_v60 = vmul.f32 %v359_v20, %v1403_v10 }
 0x148   :  { %v413_v26 = vsel %vm411_vm1, %v402_v60, 0  ;;  %v655_v3 = vsel %vm411_vm1, %v653_v21, 0 }
 0x149   :  { %v439_v30 = vand.u32 4294901760, %v413_v26  ;;  %v673_v36 = vand.u32 4294901760, %v655_v3 }
 0x14b   :  { %505 = vmatmul.f32.vlgmr.msrb.gmra.mxu3 %v439_v30  ;;  %v674_v37 = vsub.f32 %v655_v3, %v673_v36  ;;  %v440_v22 = vsub.f32 %v413_v26, %v439_v30 }
 0x14c   :  { %1238 = vmatpush.msk.msrb.mxu3 %vm1555_vm6, %v1281_v4 }
 0x14d   :  { %543 = vmatmul.f32.vlgmr.msra.gmra.mxu0 %v440_v22  ;;  %v441_v27 = vand.u32 4294901760, %v440_v22  ;;  %v675_v41 = vand.u32 4294901760, %v674_v37 }
 0x14e   :  { %1239 = vmatpush.msk.msrb.mxu3 %vm1566_vm9, %v1281_v4  ;;  %798 = vmatpush.msra.mxu0 %v691_v54 }
 0x14f   :  { %574 = vmatmul.f32.vlgmr.msra.gmra.mxu1 %v441_v27  ;;  %v442_v10 = vsub.f32 %v440_v22, %v441_v27  ;;  %v676_v42 = vsub.f32 %v674_v37, %v675_v41 }
 0x150   :  { %1240 = vmatpush.msk.msrb.mxu3 %vm1584_vm12, %v1281_v4  ;;  %801 = vmatpush.msra.mxu0 %v696_v59 }
 0x151   :  { %1246 = vmatpush.msk.msra.mxu1 %vm1555_vm6, %v1281_v4  ;;  %v443_v28 = vand.u32 4294901760, %v442_v10  ;;  %v677_v54 = vand.u32 4294901760, %v676_v42  ;;  %vm848_vm6 = vcmask 64512  }
 0x152   :  { %1241 = vmatpush.msk.msrb.mxu3 %vm1597_vm15, %v1281_v4  ;;  %804 = vmatpush.msra.mxu0 %v701_v7 }
 0x153   :  { %1247 = vmatpush.msk.msra.mxu1 %vm1566_vm9, %v1281_v4  ;;  %444 = vmatmul.f32.vlgmr.msrb.gmra.mxu2 %v443_v28 }
 0x154   :  { %648 = vmatmul.f32.vlgmr.msra.gmra.mxu3 %v439_v30  ;;  %744 = vmatpush.msrb.mxu2 %v1571_v49 }
 0x155   :  { %1242 = vmatpush.msk.msrb.mxu3 %vm1624_vm2, %v1281_v4  ;;  %807 = vmatpush.msra.mxu0 %v706_v15 }
 0x156   :  { %1248 = vmatpush.msk.msra.mxu1 %vm1584_vm12, %v1281_v4  ;;  %678 = vmatmul.f32.vlgmr.msrb.gmra.mxu0 %v677_v54 }
 0x157   :  { %746 = vmatpush.msrb.mxu2 %v1579_v52  ;;  %1243 = vmatpush.msk.msrb.mxu3 %vm1658_vm7, %v1281_v4 }
 0x158   :  { %810 = vmatpush.msra.mxu0 %v711_v25  ;;  %1249 = vmatpush.msk.msra.mxu1 %vm1597_vm15, %v1281_v4 }
 0x159   :  { %731 = vmatmul.f32.vlgmr.msrb.gmra.mxu1 %v673_v36  ;;  %748 = vmatpush.msrb.mxu2 %v1605_v0 }
 0x15a   :  { %1244 = vmatpush.msk.msrb.mxu3 %vm1672_vm11, %v1281_v4  ;;  %813 = vmatpush.msra.mxu0 %v716_v31 }
 0x15b   :  { %1250 = vmatpush.msk.msra.mxu1 %vm1624_vm2, %v1281_v4  ;;  %750 = vmatpush.msrb.mxu2 %v1618_v5  ;;  %vm854_vm2 = vcmp.eq.s32.totalorder %v1391_v63, %v1394_v1 }
 0x15c   :  { %1245 = vmatpush.msk.msrb.mxu3 %vm1689_vm14, %v1281_v4  ;;  %816 = vmatpush.msra.mxu0 %v721_v43  ;;  %v855_v18 = vsel %vm854_vm2, 1.0, %v1280_v9 }
 0x15d   :  { %1251 = vmatpush.msk.msra.mxu1 %vm1658_vm7, %v1281_v4  ;;  %619 = vmatmul.f32.vlgmr.msra.gmra.mxu2 %v439_v30  ;;  %vm1203_vm7 = vcmask 130048  }
 0x15e   :  { %784 = vmatmul.f32.vlgmr.msrb.gmra.mxu3 %v675_v41  ;;  %752 = vmatpush.msrb.mxu2 %v1646_v19 }
 0x15f   :  { %819 = vmatpush.msra.mxu0 %v726_v34  ;;  %1252 = vmatpush.msk.msra.mxu1 %vm1672_vm11, %v1281_v4 }
 0x160   :  { %821 = vmatmul.f32.vlgmr.msra.gmra.mxu0 %v673_v36  ;;  %754 = vmatpush.msrb.mxu2 %v1681_v33 }
 0x161   :  { %1253 = vmatpush.msk.msra.mxu1 %vm1689_vm14, %v1281_v4 }
 0x162   :  { %842 = vmatmul.f32.vlgmr.msra.gmra.mxu1 %v673_v36  ;;  %756 = vmatpush.msrb.mxu2 %v1696_v11 }
 0x164   :  { %758 = vmatpush.msrb.mxu2 %v1705_v39 }
 0x165   :  { %761 = vmatmul.f32.vlgmr.msrb.gmra.mxu2 %v674_v37 }
 0x1ca   :  { %v544_v52 = vpop.f32.mrf.mxu0 }
 0x1cc   :  { %v575_v59 = vpop.f32.mrf.mxu1 }
 0x1ce   :  { %v506_v44 = vpop.f32.mrf.mxu3 }
 0x1d3   :  { %v679_v35 = vpop.f32.mrf.mxu0 }
 0x1d6   :  { %v445_v46 = vpop.f32.mrf.mxu2  ;;  %v732_v16 = vpop.f32.mrf.mxu1 }
 0x1d7   :  { %v507_v49 = vadd.f32 %v506_v44, %v445_v46  ;;  %v649_v7 = vpop.f32.mrf.mxu3  ;;  %v733_v23 = vadd.f32 %v732_v16, %v679_v35 }
 0x1d9   :  { %v545_v55 = vadd.f32 %v544_v52, %v507_v49 }
 0x1db   :  { %v576_v61 = vadd.f32 %v575_v59, %v545_v55 }
 0x1dd   :  { %v822_v58 = vpop.f32.mrf.mxu0 }
 0x1df   :  { %v843_v12 = vpop.f32.mrf.mxu1 }
 0x1e0   :  { %v620_v0 = vpop.f32.mrf.mxu2 }
 0x1e1   :  { %v621_v5 = vadd.f32 %v620_v0, %v576_v61  ;;  %v785_v48 = vpop.f32.mrf.mxu3 }
 0x1e3   :  { %v650_v8 = vadd.f32 %v649_v7, %v621_v5 }
 0x1e5   :  { %v846_v15 = vmax.f32 %v650_v8, 0.0 }
 0x1e7   :  { %v849_v4 = vsel %vm848_vm6, %v846_v15, 0.0 }
 0x1e8   :  { %850 = vadd.xlane.f32.xlu2 %v849_v4  ;;  %v762_v40 = vpop.f32.mrf.mxu2 }
 0x1e9   :  { %v763_v47 = vadd.f32 %v762_v40, %v733_v23 }
 0x1eb   :  { %v786_v51 = vadd.f32 %v785_v48, %v763_v47 }
 0x1ed   :  { %v823_v2 = vadd.f32 %v822_v58, %v786_v51 }
 0x1ef   :  { %v844_v14 = vadd.f32 %v843_v12, %v823_v2 }
 0x1f1   :  { %v847_v60 = vmax.f32 %v844_v14, 0.0 }
 0x1f3   :  { %v852_v30 = vadd.f32 %v847_v60, %v846_v15 }
 0x1f5   :  { %v853_v63 = vmul.f32 0.5, %v852_v30 }
 0x25b   :  { %v851_v19 = vpop.xlane.xlu2 %850 }
 0x25c   :  { %1261 = vrsqrt.f32 %v851_v19  ;;  %vm863_vm9 = vcmp.eq.f32.partialorder %v851_v19, inf  ;;  %v866_v39 = vand.u32 2147483648, %v851_v19  ;;  %vm865_vm12 = vcmp.eq.f32.partialorder %v851_v19, 0.0 }
 0x25d   :  { %v891_v37 = vmul.f32 %v855_v18, %v851_v19 }
 0x25f   :  { %v892_v27 = vsub.f32 %v891_v37, %v853_v63 }
 0x262   :  { %v1262_v24 = vpop.eup %1261 }
 0x263   :  { %v857_v25 = vmul.f32 %v1262_v24, %v851_v19 }
 0x265   :  { %v858_v32 = vmul.f32 %v1262_v24, %v857_v25 }
 0x267   :  { %v859_v33 = vmul.f32 0.5, %v858_v32 }
 0x269   :  { %v860_v38 = vsub.f32 1.5, %v859_v33 }
 0x26b   :  { %v861_v11 = vmul.f32 %v1262_v24, %v860_v38 }
 0x26d   :  { %v862_v31 = vmul.f32 %v861_v11, %v851_v19 }
 0x26f   :  { %v864_v43 = vsel %vm863_vm9, %v851_v19, %v862_v31 }
 0x270   :  { %v867_v34 = vsel %vm865_vm12, %v866_v39, %v864_v43 }
 0x271   :  { %v868_v45 = vadd.f32 1e-07, %v867_v34 }
 0x273   :  { %1263 = vrcp.f32 %v868_v45  ;;  %v880_v29 = vand.u32 2147483648, %v868_v45  ;;  %v878_v6 = vand.u32 2147483647, %v868_v45  ;;  %vm874_vm3 = vweird.f32 %v868_v45 }
 0x275   :  { %v881_v56 = vor.u32 1.1754944e-38, %v880_v29  ;;  %vm879_vm5 = vcmp.eq.f32.partialorder %v878_v6, 8.507059e+37 }
 0x279   :  { %v1264_v50 = vpop.eup %1263 }
 0x27a   :  { %v870_v57 = vmul.f32 %v1264_v50, %v868_v45  ;;  %vm875_vm15 = vweird.f32 %v1264_v50 }
 0x27b   :  { %vm876_vm4 = vmor %vm874_vm3, %vm875_vm15 }
 0x27c   :  { %v871_v62 = vsub.f32 1.0, %v870_v57 }
 0x27e   :  { %v872_v53 = vmul.f32 %v1264_v50, %v871_v62 }
 0x280   :  { %v873_v13 = vadd.f32 %v1264_v50, %v872_v53 }
 0x282   :  { %v877_v17 = vsel %vm876_vm4, %v1264_v50, %v873_v13 }
 0x283   :  { %v882_v20 = vsel %vm879_vm5, %v881_v56, %v877_v17 }
 0x284   :  { %v883_v21 = vmul.f32 %v882_v20, %v855_v18  ;;  %v893_v42 = vmul.f32 %v892_v27, %v882_v20 }
 0x286   :  { %v884_v26 = vsel %vm848_vm6, %v883_v21, 0.0 }
 0x287   :  { %v885_v3 = vrot.slane %v884_v26, 4 }
 0x289   :  { %v886_v36 = vadd.f32 %v885_v3, %v884_v26 }
 0x28b   :  { %v887_v22 = vrot.slane %v886_v36, 2 }
 0x28d   :  { %v888_v1 = vadd.f32 %v887_v22, %v886_v36 }
 0x28f   :  { %v889_v41 = vrot.slane %v888_v1, 1 }
 0x291   :  { %v890_v10 = vadd.f32 %v889_v41, %v888_v1 }
 0x293   :  { %v1812_v28 = vmul.f32 %v893_v42, %v890_v10 }
 0x295   :  { %v913_v9 = vand.u32 4294901760, %v1812_v28  ;;  %v896_v54 = vsel %vm848_vm6, %v1812_v28, 0 }
 0x296   :  { %v915_v44 = vand.u32 4294901760, %v896_v54 }
 0x297   :  { %914 = vmatpush.msra.mxu2 %v913_v9  ;;  %990 = vmatpush.msrb.mxu1 %v913_v9  ;;  %v940_v46 = vsub.f32 %v1812_v28, %v913_v9 }
 0x298   :  { %v916_v49 = vsub.f32 %v896_v54, %v915_v44 }
 0x299   :  { %967 = vmatpush.msrb.mxu0 %v940_v46  ;;  %v941_v52 = vand.u32 4294901760, %v940_v46 }
 0x29a   :  { %970 = vmatmul.f32.vlgmr.msrb.gmra.mxu0 %v916_v49  ;;  %v917_v55 = vand.u32 4294901760, %v916_v49 }
 0x29b   :  { %1016 = vmatpush.msrb.mxu2 %v941_v52  ;;  %v942_v59 = vsub.f32 %v940_v46, %v941_v52 }
 0x29c   :  { %994 = vmatmul.f32.vlgmr.msrb.gmra.mxu1 %v917_v55  ;;  %v918_v61 = vsub.f32 %v916_v49, %v917_v55 }
 0x29d   :  { %v943_v0 = vand.u32 4294901760, %v942_v59 }
 0x29e   :  { %v919_v5 = vand.u32 4294901760, %v918_v61 }
 0x29f   :  { %944 = vmatpush.msra.mxu3 %v943_v0 }
 0x2a0   :  { %920 = vmatmul.f32.vlgmr.msra.gmra.mxu2 %v919_v5  ;;  %946 = vmatmul.f32.vlgmr.msra.gmra.mxu3 %v915_v44 }
 0x2a1   :  { %1038 = vmatpush.msrb.mxu3 %v913_v9 }
 0x2a8   :  { %1018 = vmatmul.f32.vlgmr.msrb.gmra.mxu2 %v915_v44  ;;  %1040 = vmatmul.f32.vlgmr.msrb.gmra.mxu3 %v915_v44 }
 0x317   :  { %v971_v4 = vpop.f32.mrf.mxu0 }
 0x319   :  { %v995_v24 = vpop.f32.mrf.mxu1 }
 0x323   :  { %v921_v7 = vpop.f32.mrf.mxu2  ;;  %v947_v8 = vpop.f32.mrf.mxu3 }
 0x324   :  { %v948_v15 = vadd.f32 %v947_v8, %v921_v7 }
 0x326   :  { %v972_v19 = vadd.f32 %v971_v4, %v948_v15 }
 0x328   :  { %v996_v25 = vadd.f32 %v995_v24, %v972_v19 }
 0x32b   :  { %v1019_v32 = vpop.f32.mrf.mxu2  ;;  %v1041_v38 = vpop.f32.mrf.mxu3 }
 0x32c   :  { %v1020_v33 = vadd.f32 %v1019_v32, %v996_v25 }
 0x32e   :  { %v1042_v11 = vadd.f32 %v1041_v38, %v1020_v33 }
 0x330   :  { %v1044_v31 = vmul.f32 2.0, %v1042_v11 }
 0x332   :  { %v1045_v39 = vsub.f32 %v1044_v31, %v855_v18 }
 0x334   :  { %1195 = vrot.lane.b32.xlu2 %v1045_v39, %s1282_s8  ;;  %v1061_v43 = vand.u32 4294901760, %v1045_v39 }
 0x336   :  { %1062 = vmatpush.msra.mxu0 %v1061_v43  ;;  %1138 = vmatpush.msra.mxu3 %v1061_v43  ;;  %v1088_v16 = vsub.f32 %v1045_v39, %v1061_v43 }
 0x337   :  { %1068 = vmatmul.f32.vlgmr.msra.gmra.mxu0 %v919_v5  ;;  %1142 = vmatmul.f32.vlgmr.msra.gmra.mxu3 %v917_v55 }
 0x338   :  { %1115 = vmatpush.msra.mxu2 %v1088_v16  ;;  %v1089_v34 = vand.u32 4294901760, %v1088_v16 }
 0x339   :  { %1118 = vmatmul.f32.vlgmr.msra.gmra.mxu2 %v916_v49 }
 0x33a   :  { %1164 = vmatpush.msrb.mxu0 %v1089_v34  ;;  %v1090_v45 = vsub.f32 %v1088_v16, %v1089_v34 }
 0x33c   :  { %v1091_v35 = vand.u32 4294901760, %v1090_v45 }
 0x33e   :  { %1092 = vmatpush.msra.mxu1 %v1091_v35 }
 0x33f   :  { %1094 = vmatmul.f32.vlgmr.msra.gmra.mxu1 %v915_v44  ;;  %1166 = vmatmul.f32.vlgmr.msrb.gmra.mxu0 %v915_v44 }
 0x340   :  { %1186 = vmatpush.msrb.mxu1 %v1061_v43 }
 0x347   :  { %1188 = vmatmul.f32.vlgmr.msrb.gmra.mxu1 %v915_v44 }
 0x38e   :  { %v1196_v12 = vpop.permute.xlu2 %1195 }
 0x38f   :  { %v1202_v13 = vsel %vm848_vm6, %v1812_v28, %v1196_v12 }
 0x3b4   :  { %v1069_v40 = vpop.f32.mrf.mxu0 }
 0x3ba   :  { %v1143_v51 = vpop.f32.mrf.mxu3 }
 0x3bc   :  { %v1095_v23 = vpop.f32.mrf.mxu1  ;;  %v1119_v48 = vpop.f32.mrf.mxu2 }
 0x3bd   :  { %v1096_v47 = vadd.f32 %v1095_v23, %v1069_v40  ;;  %v1167_v58 = vpop.f32.mrf.mxu0 }
 0x3bf   :  { %v1120_v50 = vadd.f32 %v1119_v48, %v1096_v47 }
 0x3c1   :  { %v1144_v57 = vadd.f32 %v1143_v51, %v1120_v50 }
 0x3c3   :  { %v1168_v62 = vadd.f32 %v1167_v58, %v1144_v57 }
 0x3c4   :  { %v1189_v2 = vpop.f32.mrf.mxu1 }
 0x3c5   :  { %v1190_v29 = vadd.f32 %v1189_v2, %v1168_v62 }
 0x3c7   :  { %v1192_v53 = vmul.f32 2.0, %v1190_v29 }
 0x3c9   :  { %v1193_v6 = vsub.f32 %v1192_v53, %v1812_v28 }
 0x3cb   :  { %1199 = vrot.lane.b32.xlu0 %v1193_v6, %s1283_s3 }
 0x43d   :  { %v1200_v14 = vpop.permute.xlu0 %1199 }
 0x43e   :  { %v1204_v56 = vsel %vm1203_vm7, %v1202_v13, %v1200_v14 }
 0x43f   :  { %1206 = vst.msk [vmem:[%s1833_s9] sm:$0xff] %vm1205_vm8, %v1204_v56 }
 0x440   :  { %1211 = vsyncpa [#allocation5], 1 }

</bundles_post_ra>
